<compile_context>
chip_gen: v7x
topology: tpu7x:2x2x1
jax: 0.10.0
libtpu: 0.0.40
codegen_flags: <defaults>
</compile_context>

<pallas_src>
import jax
import jax.numpy as jnp
from jax.experimental import pallas as pl
from jax.experimental.pallas import tpu as pltpu


def _membrane_kernel(x_ref, w_ref, o_ref):
    # x_ref: (tr, W*T) lane-dense input rows
    # w_ref: (W*T, W)  block-diagonal coefficient matrix (resident constant)
    # o_ref: (tr, W)
    x = x_ref[...].astype(jnp.float32)
    acc = jnp.dot(
        x,
        w_ref[...],
        preferred_element_type=jnp.float32,
        precision=jax.lax.Precision.HIGHEST,  # full f32-accuracy MXU path
    )
    o_ref[...] = acc.astype(o_ref.dtype)


def membrane_output_layer(x, T=None):
    """x: (N, C, H, W, T) -> (N, C, H, W), matching the PyTorch module."""
    N, C, H, W, Tdim = x.shape
    if T is None:
        T = Tdim
    assert T == Tdim

    R = N * C * H          # rows  -> sublane axis
    L = W * T              # lanes -> T is innermost, so this reshape is free
    x2 = x.reshape(R, L)   # no HBM data movement

    # Block-diagonal coefficient matrix: wmat[w*T + t, w] = 0.8 ** (T-1-t).
    coef = jnp.power(0.8, jnp.arange(T - 1, -1, -1, dtype=jnp.float32))   # (T,)
    eye_w = jnp.eye(W, dtype=jnp.float32)                                 # (W, W)
    wmat = (eye_w[:, None, :] * coef[None, :, None]).reshape(L, W)        # (L, W)

    # Row tile: target ~4 MiB per pipelined (x block + out block); with
    # double-buffering that is < ~10 MiB VMEM on every TPU generation.
    bytes_per_elt = max(jnp.dtype(x.dtype).itemsize, 4)   # kernel computes in f32
    per_row_bytes = (L + W) * bytes_per_elt
    budget = 4 * 1024 * 1024
    r_ceil = ((R + 7) // 8) * 8
    tr = (budget // per_row_bytes) // 8 * 8
    tr = max(tr, 8)
    # Prefer >= 8 grid steps (megacore / v7x dual TC) when blocks stay >= 1 MiB.
    eighth_rows = ((r_ceil // 8) // 8) * 8
    if eighth_rows > 0 and eighth_rows * per_row_bytes >= (1 << 20):
        tr = min(tr, eighth_rows)
    tr = int(min(tr, r_ceil))

    grid = (pl.cdiv(R, tr),)

    out_flat = pl.pallas_call(
        _membrane_kernel,
        out_shape=jax.ShapeDtypeStruct((R, W), x.dtype),
        grid_spec=pltpu.PrefetchScalarGridSpec(
            num_scalar_prefetch=0,
            grid=grid,
            in_specs=[
                pl.BlockSpec((tr, L), lambda i: (i, 0)),   # big lane-dense x tile
                pl.BlockSpec((L, W), lambda i: (0, 0)),    # resident coef matrix
            ],
            out_specs=pl.BlockSpec((tr, W), lambda i: (i, 0)),
        ),
        compiler_params=pltpu.CompilerParams(
            dimension_semantics=("parallel",)),
    )(x2, wmat)

    return out_flat.reshape(N, C, H, W)


if __name__ == "__main__":
    key = jax.random.PRNGKey(0)
    N, C, H, W, T = 2, 4, 16, 16, 8
    x = jax.random.normal(key, (N, C, H, W, T), dtype=jnp.float32)

    out = membrane_output_layer(x, T)
    out = jax.block_until_ready(out)

    # Pure-JAX reference check.
    coef = jnp.power(0.8, jnp.arange(T - 1, -1, -1, dtype=jnp.float32))
    ref = jnp.sum(x * coef[None, None, None, None, :], axis=-1)
    assert out.shape == (N, C, H, W)
    assert jnp.allclose(out, ref, atol=1e-4, rtol=1e-4), "mismatch vs reference"

    print("KERNEL_OK")
</pallas_src>

<mosaic_0001>
module attributes {stable_mosaic.version = 11 : i64} {
  func.func @_membrane_kernel(%arg0: i32, %arg1: memref<128x128xf32, #tpu.memory_space<vmem>>, %arg2: memref<128x16xf32, #tpu.memory_space<vmem>>, %arg3: memref<128x16xf32, #tpu.memory_space<vmem>>) attributes {dimension_semantics = [#tpu.dimension_semantics<parallel>], iteration_bounds = array<i64: 1>, scalar_prefetch = 0 : i64, scratch_operands = 0 : i64, tpu.core_type = #tpu.core_type<tc>, window_params = [{transform_indices = @transform_0, window_bounds = array<i64: 128, 128>}, {pipeline_mode = #tpu.pipeline_mode<synchronous>, transform_indices = @transform_1, window_bounds = array<i64: 128, 16>}, {transform_indices = @transform_2, window_bounds = array<i64: 128, 16>}]} {
    %c0 = arith.constant 0 : index
    %c0_0 = arith.constant 0 : index
    %0 = vector.load %arg1[%c0, %c0_0] : memref<128x128xf32, #tpu.memory_space<vmem>>, vector<128x128xf32>
    %c0_1 = arith.constant 0 : index
    %c0_2 = arith.constant 0 : index
    %1 = vector.load %arg2[%c0_1, %c0_2] : memref<128x16xf32, #tpu.memory_space<vmem>>, vector<128x16xf32>
    %cst = arith.constant dense<0.000000e+00> : vector<128x16xf32>
    %2 = tpu.matmul %0, %1, %cst {dimension_numbers = #tpu.dot_dimension_numbers<[1], [0], [0], [1], [0, 0, 1, 1], [], []>, precision = #tpu.contract_precision<fp32>} : vector<128x128xf32>, vector<128x16xf32>, vector<128x16xf32> -> vector<128x16xf32>
    %c0_3 = arith.constant 0 : index
    %c0_4 = arith.constant 0 : index
    %3 = vector.load %arg3[%c0_3, %c0_4] : memref<128x16xf32, #tpu.memory_space<vmem>>, vector<128x16xf32>
    tpu.vector_store %arg3[%c0_3, %c0_4], %2 {strides = array<i32>} : memref<128x16xf32, #tpu.memory_space<vmem>>, vector<128x16xf32>,
    return
  }
  func.func @transform_0(%arg0: i32) -> (i32, i32) {
    %c0_i32 = arith.constant 0 : i32
    %c0_i32_0 = arith.constant 0 : i32
    return %arg0, %c0_i32 : i32, i32
  }
  func.func @transform_1(%arg0: i32) -> (i32, i32) {
    %c0_i32 = arith.constant 0 : i32
    %c0_i32_0 = arith.constant 0 : i32
    %c0_i32_1 = arith.constant 0 : i32
    return %c0_i32, %c0_i32_0 : i32, i32
  }
  func.func @transform_2(%arg0: i32) -> (i32, i32) {
    %c0_i32 = arith.constant 0 : i32
    %c0_i32_0 = arith.constant 0 : i32
    return %arg0, %c0_i32 : i32, i32
  }
}

</mosaic_0001>

<bundles_post_ra>
// kernel: tpu_custom_call.1
= control target key start
LH: loop header
LB: loop body
LE: loop exit
PB: predicated region body
PF: predicated region fallthrough
CT: control target
= control target key end

     0   :  { %vm1329_vm0 = vcmask 130048   ;;  %s2834_s1 = inlined_call_operand.vmem [shape: f32[128,16], index: 1, kind: input, shape index: {}]   ;;  %s2835_s0 = inlined_call_operand.vmem [shape: f32[128,128], index: 0, kind: input, shape index: {}]   ;;  %s2836_s2 = inlined_call_operand.vmem [shape: f32[128,16], index: 2, kind: output, shape index: {}]  }
   0x1   :  { %v27_v0 = vld [vmem:[%s2834_s1] sm:$0xff]  ;;  %v28_v1 = vld [vmem:[%s2834_s1 + $0x8] sm:$0xff]  ;;  %v29_v2 = vld [vmem:[%s2834_s1 + $0x10] sm:$0xff] }
   0x2   :  { %v44_v3 = vand.u32 4294901760, %v27_v0  ;;  %v47_v4 = vand.u32 4294901760, %v28_v1  ;;  %v30_v5 = vld [vmem:[%s2834_s1 + $0x18] sm:$0xff]  ;;  %v50_v6 = vand.u32 4294901760, %v29_v2  ;;  %v2180_v7 = vld [vmem:[%s2834_s1 + $0x20] sm:$0xff]  ;;  %v2185_v8 = vld [vmem:[%s2834_s1 + $0x28] sm:$0xff] }
   0x3   :  { %v53_v9 = vand.u32 4294901760, %v30_v5  ;;  %v56_v11 = vand.u32 4294901760, %v2180_v7  ;;  %v59_v12 = vand.u32 4294901760, %v2185_v8  ;;  %v2196_v14 = vld [vmem:[%s2834_s1 + $0x30] sm:$0xff]  ;;  %v2201_v15 = vld [vmem:[%s2834_s1 + $0x38] sm:$0xff]  ;;  %v11_v16 = vld [vmem:[%s2835_s0] sm:$0xff] }
   0x4   :  { %v2187_v10 = vpack.c.bf16 %v47_v4, %v44_v3  ;;  %v2210_v17 = vand.u32 4294901760, %v11_v16  ;;  %v62_v19 = vand.u32 4294901760, %v2196_v14  ;;  %v65_v20 = vand.u32 4294901760, %v2201_v15  ;;  %v12_v21 = vld [vmem:[%s2835_s0 + $0x8] sm:$0xff]  ;;  %v2228_v22 = vld [vmem:[%s2834_s1 + $0x40] sm:$0xff]  ;;  %v2256_v30 = vld [vmem:[%s2834_s1 + $0x50] sm:$0xff] }
   0x5   :  { %v2191_v13 = vpack.c.bf16 %v53_v9, %v50_v6  ;;  %v2218_v18 = vpack.c.bf16 %v59_v12, %v56_v11  ;;  %v2233_v23 = vld [vmem:[%s2834_s1 + $0x48] sm:$0xff]  ;;  %v2241_v26 = vand.u32 4294901760, %v12_v21  ;;  %v2847_v28 = vand.u32 4294901760, %v2228_v22  ;;  %v13_v31 = vld [vmem:[%s2835_s0 + $0x10] sm:$0xff]  ;;  %v2264_v32 = vld [vmem:[%s2834_s1 + $0x58] sm:$0xff] }
   0x6   :  { %1879 = vmatprep.subr.bf16.mxu1 %v2187_v10  ;;  %1975 = vmatprep.subr.bf16.mxu0 %v2187_v10  ;;  %v2236_v24 = vsub.f32 %v11_v16, %v2210_v17  ;;  %v2249_v27 = vpack.c.bf16 %v65_v20, %v62_v19  ;;  %v2845_v29 = vand.u32 4294901760, %v2233_v23  ;;  %v14_v34 = vld [vmem:[%s2835_s0 + $0x18] sm:$0xff]  ;;  %v2270_v35 = vsub.f32 %v27_v0, %v44_v3  ;;  %v2280_v38 = vld [vmem:[%s2834_s1 + $0x60] sm:$0xff]  ;;  %v2285_v39 = vld [vmem:[%s2834_s1 + $0x68] sm:$0xff] }
   0x7   :  { %1881 = vmatpush3.bf16.msra.mxu1 %v2187_v10  ;;  %1977 = vmatpush3.bf16.msra.mxu0 %v2187_v10  ;;  %v2272_v36 = vsub.f32 %v28_v1, %v47_v4  ;;  %v2844_v37 = vand.u32 4294901760, %v2256_v30  ;;  %v2288_v41 = vsub.f32 %v12_v21, %v2241_v26  ;;  %v2290_v42 = vand.u32 4294901760, %v13_v31  ;;  %v2304_v45 = vld [vmem:[%s2834_s1 + $0x70] sm:$0xff]  ;;  %v2309_v46 = vld [vmem:[%s2834_s1 + $0x78] sm:$0xff]  ;;  %v15_v50 = vld [vmem:[%s2835_s0 + $0x20] sm:$0xff] }
   0x8   :  { %1883 = vmatprep.subr.bf16.mxu1 %v2191_v13  ;;  %1979 = vmatprep.subr.bf16.mxu0 %v2191_v13  ;;  %2880 = vst [vmem:[#allocation2_spill] sm:$0xff] %v2236_v24  ;;  %v126_v25 = vand.u32 4294901760, %v2236_v24  ;;  %2881 = vst [vmem:[#allocation3_spill] sm:$0xff] %v2249_v27  ;;  %v2298_v43 = vpack.c.bf16 %v2845_v29, %v2847_v28  ;;  %v2842_v44 = vand.u32 4294901760, %v2264_v32  ;;  %v2311_v47 = vand.u32 4294901760, %v14_v34  ;;  %v16_v55 = vld [vmem:[%s2835_s0 + $0x28] sm:$0xff] }
   0x9   :  { %2882 = vst [vmem:[#allocation4_spill] sm:$0xff] %v2288_v41  ;;  %v2313_v48 = vsub.f32 %v29_v2, %v50_v6  ;;  %v2315_v49 = vsub.f32 %v30_v5, %v53_v9  ;;  %v2840_v51 = vand.u32 4294901760, %v2280_v38  ;;  %v2839_v52 = vand.u32 4294901760, %v2285_v39  ;;  %v17_v2 = vld [vmem:[%s2835_s0 + $0x30] sm:$0xff]  ;;  %v18_v9 = vld [vmem:[%s2835_s0 + $0x38] sm:$0xff] }
   0xa   :  { %v127_v33 = vsub.f32 %v2236_v24, %v126_v25  ;;  %1742 = vmatprep.mubr.f32.mxu0 %v126_v25  ;;  %2883 = vst [vmem:[#allocation5_spill] sm:$0xff] %v2298_v43  ;;  %v287_v53 = vand.u32 4294901760, %v2270_v35  ;;  %v294_v54 = vand.u32 4294901760, %v2272_v36  ;;  %v2838_v56 = vand.u32 4294901760, %v2304_v45 }
   0xb   :  { %1885 = vmatpush3.bf16.msra.mxu1 %v2191_v13  ;;  %1981 = vmatpush3.bf16.msra.mxu0 %v2191_v13  ;;  %v2837_v57 = vand.u32 4294901760, %v2309_v46  ;;  %v2841_v58 = vand.u32 4294901760, %v2288_v41  ;;  %v2333_v59 = vsub.f32 %v13_v31, %v2290_v42  ;;  %v2341_v60 = vpack.c.bf16 %v2842_v44, %v2844_v37 }
   0xc   :  { %1887 = vmatprep.subr.bf16.mxu1 %v2218_v18  ;;  %1983 = vmatprep.subr.bf16.mxu0 %v2218_v18  ;;  %v128_v40 = vand.u32 4294901760, %v127_v33  ;;  %v2344_v61 = vsub.f32 %v14_v34, %v2311_v47  ;;  %v301_v62 = vand.u32 4294901760, %v2313_v48  ;;  %v2347_v63 = vand.u32 4294901760, %v15_v50 }
   0xd   :  { %2884 = vst [vmem:[#allocation6_spill] sm:$0xff] %v2333_v59  ;;  %2885 = vst [vmem:[#allocation7_spill] sm:$0xff] %v2341_v60  ;;  %v308_v0 = vand.u32 4294901760, %v2315_v49  ;;  %v2350_v1 = vand.u32 4294901760, %v16_v55  ;;  %v288_v3 = vsub.f32 %v2270_v35, %v287_v53  ;;  %v295_v4 = vsub.f32 %v2272_v36, %v294_v54 }
   0xe   :  { %1574 = vmatprep.mubr.f32.mxu1 %v128_v40  ;;  %2886 = vst [vmem:[#allocation8_spill] sm:$0xff] %v2344_v61  ;;  %v2360_v5 = vsub.f32 %v2180_v7, %v56_v11  ;;  %v2365_v6 = vsub.f32 %v2185_v8, %v59_v12  ;;  %v2376_v16 = vpack.c.bf16 %v2839_v52, %v2840_v51  ;;  %v2843_v11 = vand.u32 4294901760, %v2333_v59 }
   0xf   :  { %1889 = vmatpush3.bf16.msra.mxu1 %v2218_v18  ;;  %1985 = vmatpush3.bf16.msra.mxu0 %v2218_v18  ;;  %v2382_v7 = vpack.c.bf16 %v2837_v57, %v2838_v56  ;;  %v2387_v8 = vsub.f32 %v2288_v41, %v2841_v58  ;;  %v2846_v12 = vand.u32 4294901760, %v2344_v61  ;;  %v302_v21 = vsub.f32 %v2313_v48, %v301_v62 }
  0x10   :  { %1891 = vmatprep.subr.bf16.mxu1 %v2249_v27  ;;  %1987 = vmatprep.subr.bf16.mxu0 %v2249_v27  ;;  %2887 = vst [vmem:[#allocation9_spill] sm:$0xff] %v2376_v16  ;;  %v2395_v25 = vsub.f32 %v15_v50, %v2347_v63  ;;  %v2397_v31 = vand.u32 4294901760, %v17_v2  ;;  %v309_v33 = vsub.f32 %v2315_v49, %v308_v0  ;;  %v2403_v40 = vand.u32 4294901760, %v18_v9 }
  0x11   :  { %2888 = vst [vmem:[#allocation10_spill] sm:$0xff] %v2382_v7  ;;  %v2401_v34 = vsub.f32 %v16_v55, %v2350_v1  ;;  %v2408_v57 = vsub.f32 %v2196_v14, %v62_v19  ;;  %v289_v56 = vand.u32 4294901760, %v288_v3  ;;  %v296_v52 = vand.u32 4294901760, %v295_v4  ;;  %v19_v19 = vld [vmem:[%s2835_s0 + $0x40] sm:$0xff] }
  0x12   :  { %2889 = vst [vmem:[#allocation11_spill] sm:$0xff] %v2395_v25  ;;  %2890 = vst [vmem:[#allocation12_spill] sm:$0xff] %v2397_v31  ;;  %v315_v51 = vand.u32 4294901760, %v2360_v5  ;;  %v322_v50 = vand.u32 4294901760, %v2365_v6  ;;  %v138_v55 = vand.u32 4294901760, %v2387_v8  ;;  %v2415_v58 = vpack.c.bf16 %v294_v54, %v287_v53 }
  0x13   :  { %1893 = vmatpush3.bf16.msra.mxu1 %v2249_v27  ;;  %1989 = vmatpush3.bf16.msra.mxu0 %v2249_v27  ;;  %2891 = vst [vmem:[#allocation13_spill] sm:$0xff] %v2401_v34  ;;  %2892 = vst [vmem:[#allocation14_spill] sm:$0xff] %v2403_v40  ;;  %v2420_v44 = vsub.f32 %v2333_v59, %v2843_v11  ;;  %v2425_v14 = vsub.f32 %v2201_v15, %v65_v20  ;;  %v303_v54 = vand.u32 4294901760, %v302_v21 }
  0x14   :  { %1895 = vmatprep.subr.bf16.mxu1 %v2298_v43  ;;  %1991 = vmatprep.subr.bf16.mxu0 %v2298_v43  ;;  %v2435_v53 = vsub.f32 %v2344_v61, %v2846_v12  ;;  %v2851_v3 = vand.u32 4294901760, %v2395_v25  ;;  %v2439_v4 = vsub.f32 %v17_v2, %v2397_v31  ;;  %v310_v15 = vand.u32 4294901760, %v309_v33 }
  0x15   :  { %v2443_v8 = vsub.f32 %v18_v9, %v2403_v40  ;;  %v1910_v37 = vpack.c.bf16 %v296_v52, %v289_v56  ;;  %v316_v29 = vsub.f32 %v2360_v5, %v315_v51  ;;  %v323_v12 = vsub.f32 %v2365_v6, %v322_v50  ;;  %v20_v9 = vld [vmem:[%s2835_s0 + $0x48] sm:$0xff] }
  0x16   :  { %2893 = vst [vmem:[#allocation15_spill] sm:$0xff] %v2439_v4  ;;  %v2448_v28 = vand.u32 4294901760, %v19_v19  ;;  %v148_v2 = vand.u32 4294901760, %v2420_v44  ;;  %v336_v21 = vand.u32 4294901760, %v2425_v14  ;;  %v2896_v52 = vand.u32 4294901760, %v2228_v22 }
  0x17   :  { %1897 = vmatpush3.bf16.msra.mxu1 %v2298_v43  ;;  %1993 = vmatpush3.bf16.msra.mxu0 %v2298_v43  ;;  %2894 = vst [vmem:[#allocation16_spill] sm:$0xff] %v2443_v8  ;;  %v2897_v33 = vand.u32 4294901760, %v2233_v23  ;;  %v158_v44 = vand.u32 4294901760, %v2435_v53  ;;  %v2010_v20 = vpack.c.bf16 %v308_v0, %v301_v62  ;;  %v2473_v24 = vsub.f32 %v2395_v25, %v2851_v3 }
  0x18   :  { %1899 = vmatprep.subr.bf16.mxu1 %v2341_v60  ;;  %1995 = vmatprep.subr.bf16.mxu0 %v2341_v60  ;;  %2895 = vst [vmem:[#allocation17_spill] sm:$0xff] %v2448_v28  ;;  %v2460_v56 = vsub.f32 %v2228_v22, %v2896_v52  ;;  %v21_v52 = vld [vmem:[%s2835_s0 + $0x50] sm:$0xff]  ;;  %v2899_v62 = vand.u32 4294901760, %v2408_v57  ;;  %v317_v3 = vand.u32 4294901760, %v316_v29  ;;  %v2489_v22 = vsub.f32 %v19_v19, %v2448_v28  ;;  %v22_v29 = vld [vmem:[%s2835_s0 + $0x58] sm:$0xff] }
  0x19   :  { %v2465_v11 = vsub.f32 %v2233_v23, %v2897_v33  ;;  %v1914_v23 = vpack.c.bf16 %v310_v15, %v303_v54  ;;  %v2898_v33 = vand.u32 4294901760, %v2401_v34  ;;  %v2491_v43 = vand.u32 4294901760, %v20_v9 }
  0x1a   :  { %v330_v0 = vsub.f32 %v2408_v57, %v2899_v62  ;;  %v337_v54 = vsub.f32 %v2425_v14, %v336_v21  ;;  %v2498_v53 = vand.u32 4294901760, %v21_v52  ;;  %v2505_v19 = vpack.c.bf16 %v322_v50, %v315_v51 }
  0x1b   :  { %1901 = vmatpush3.bf16.msra.mxu1 %v2341_v60  ;;  %1997 = vmatpush3.bf16.msra.mxu0 %v2341_v60  ;;  %v324_v60 = vand.u32 4294901760, %v323_v12  ;;  %v168_v12 = vand.u32 4294901760, %v2473_v24  ;;  %v2900_v62 = vand.u32 4294901760, %v2439_v4  ;;  %v2902_v40 = vand.u32 4294901760, %v2443_v8 }
  0x1c   :  { %1903 = vmatprep.subr.bf16.mxu1 %v2376_v16  ;;  %1999 = vmatprep.subr.bf16.mxu0 %v2376_v16  ;;  %v331_v24 = vand.u32 4294901760, %v330_v0  ;;  %v2903_v51 = vand.u32 4294901760, %v2264_v32  ;;  %v2537_v0 = vand.u32 4294901760, %v22_v29 }
  0x1d   :  { %v2521_v27 = vsub.f32 %v2443_v8, %v2902_v40  ;;  %v2535_v40 = vsub.f32 %v20_v9, %v2491_v43 }
  0x1e   :  { %v2526_v50 = vsub.f32 %v2264_v32, %v2903_v51  ;;  %v338_v32 = vand.u32 4294901760, %v337_v54  ;;  %v2905_v51 = vand.u32 4294901760, %v2460_v56 }
  0x1f   :  { %1905 = vmatpush3.bf16.msra.mxu1 %v2376_v16  ;;  %2001 = vmatpush3.bf16.msra.mxu0 %v2376_v16  ;;  %v2482_v16 = vsub.f32 %v2401_v34, %v2898_v33  ;;  %v2901_v33 = vand.u32 4294901760, %v2256_v30 }
  0x20   :  { %1907 = vmatprep.subr.bf16.mxu1 %v2382_v7  ;;  %2003 = vmatprep.subr.bf16.mxu0 %v2382_v7  ;;  %v344_v31 = vsub.f32 %v2460_v56, %v2905_v51  ;;  %v2908_v51 = vand.u32 4294901760, %v2280_v38 }
  0x21   :  { %v2515_v15 = vsub.f32 %v2256_v30, %v2901_v33  ;;  %v178_v28 = vand.u32 4294901760, %v2482_v16  ;;  %v2904_v30 = vand.u32 4294901760, %v2288_v41  ;;  %v1918_v16 = vpack.c.bf16 %v324_v60, %v317_v3  ;;  %v24_v3 = vld [vmem:[%s2835_s0 + $0x68] sm:$0xff] }
  0x22   :  { %v2547_v60 = vsub.f32 %v21_v52, %v2498_v53  ;;  %v198_v52 = vand.u32 4294901760, %v2521_v27  ;;  %v2912_v27 = vand.u32 4294901760, %v2489_v22 }
  0x23   :  { %1909 = vmatpush3.bf16.msra.mxu1 %v2382_v7  ;;  %2005 = vmatpush3.bf16.msra.mxu0 %v2382_v7  ;;  %v2510_v7 = vsub.f32 %v2439_v4, %v2900_v62  ;;  %v23_v62 = vld [vmem:[%s2835_s0 + $0x60] sm:$0xff] }
  0x24   :  { %1911 = vmatprep.subr.bf16.mxu1 %v1910_v37  ;;  %2007 = vmatprep.subr.bf16.mxu0 %v2415_v58  ;;  %v2556_v54 = vand.u32 4294901760, %v23_v62 }
  0x26   :  { %1575 = vmatmul.mubr.f32.vlgmr.msra.gmra.mrb[0].mxu1 %v138_v55  ;;  %1743 = vmatmul.mubr.f32.vlgmr.msra.gmra.mrb[0].mxu0 %v2904_v30  ;;  %v2906_v55 = vand.u32 4294901760, %v2465_v11 }
  0x27   :  { %1913 = vmatpush3.bf16.msra.mxu1 %v1910_v37  ;;  %2009 = vmatpush3.bf16.msra.mxu0 %v2415_v58  ;;  %v2907_v37 = vand.u32 4294901760, %v2333_v59  ;;  %v188_v58 = vand.u32 4294901760, %v2510_v7  ;;  %v2910_v7 = vand.u32 4294901760, %v2285_v39  ;;  %v25_v59 = vld [vmem:[%s2835_s0 + $0x70] sm:$0xff] }
  0x28   :  { %v351_v30 = vsub.f32 %v2465_v11, %v2906_v55  ;;  %1577 = vmatprep.mubr.f32.mxu1 %v148_v2  ;;  %v2561_v55 = vsub.f32 %v2280_v38, %v2908_v51  ;;  %1915 = vmatprep.subr.bf16.mxu1 %v1914_v23  ;;  %v2909_v2 = vand.u32 4294901760, %v2408_v57  ;;  %v2911_v38 = vand.u32 4294901760, %v2344_v61 }
  0x29   :  { %1745 = vmatprep.mubr.f32.mxu0 %v2907_v37  ;;  %2011 = vmatprep.subr.bf16.mxu0 %v2010_v20  ;;  %v2570_v9 = vsub.f32 %v2285_v39, %v2910_v7  ;;  %v207_v51 = vsub.f32 %v2489_v22, %v2912_v27  ;;  %v2584_v37 = vand.u32 4294901760, %v24_v3  ;;  %v1922_v39 = vpack.c.bf16 %v338_v32, %v331_v24 }
  0x2a   :  { %v2018_v33 = vpack.c.bf16 %v336_v21, %v2909_v2  ;;  %1578 = vmatmul.mubr.f32.gmra.mrb[2].mxu1 %v158_v44  ;;  %1746 = vmatmul.mubr.f32.gmra.mrb[2].mxu0 %v2911_v38  ;;  %v2582_v2 = vsub.f32 %v22_v29, %v2537_v0  ;;  %v345_v7 = vand.u32 4294901760, %v344_v31  ;;  %v352_v41 = vand.u32 4294901760, %v351_v30  ;;  %v26_v38 = vld [vmem:[%s2835_s0 + $0x78] sm:$0xff] }
  0x2b   :  { %2914 = vst [vmem:[#allocation19_spill] sm:$0xff] %v2584_v37  ;;  %1917 = vmatpush3.bf16.msra.mxu1 %v1914_v23  ;;  %2013 = vmatpush3.bf16.msra.mxu0 %v2010_v20  ;;  %v2915_v27 = vand.u32 4294901760, %v2395_v25  ;;  %v2916_v29 = vand.u32 4294901760, %v2515_v15  ;;  %v2596_v23 = vsub.f32 %v23_v62, %v2556_v54  ;;  %v2599_v20 = vand.u32 4294901760, %v25_v59 }
  0x2c   :  { %2913 = vst [vmem:[#allocation18_spill] sm:$0xff] %v2582_v2  ;;  %1580 = vmatprep.mubr.f32.mxu1 %v168_v12  ;;  %1919 = vmatprep.subr.bf16.mxu1 %v1918_v16  ;;  %v2919_v24 = vand.u32 4294901760, %v2526_v50  ;;  %v378_v32 = vand.u32 4294901760, %v2570_v9  ;;  %v2920_v30 = vand.u32 4294901760, %v2304_v45  ;;  %v2921_v62 = vand.u32 4294901760, %v2309_v46 }
  0x2d   :  { %1748 = vmatprep.mubr.f32.mxu0 %v2915_v27  ;;  %v358_v21 = vsub.f32 %v2515_v15, %v2916_v29  ;;  %2917 = vst [vmem:[#allocation20_spill] sm:$0xff] %v2596_v23  ;;  %2918 = vst [vmem:[#allocation21_spill] sm:$0xff] %v2599_v20  ;;  %2015 = vmatprep.subr.bf16.mxu0 %v2505_v19  ;;  %v2922_v31 = vand.u32 4294901760, %v2401_v34  ;;  %v2923_v44 = vand.u32 4294901760, %v2535_v40  ;;  %v236_v25 = vand.u32 4294901760, %v2582_v2 }
  0x2e   :  { %v365_v12 = vsub.f32 %v2526_v50, %v2919_v24  ;;  %v2609_v27 = vsub.f32 %v2304_v45, %v2920_v30  ;;  %v2614_v29 = vsub.f32 %v2309_v46, %v2921_v62  ;;  %1581 = vmatmul.mubr.f32.gmra.mrb[4].mxu1 %v178_v28  ;;  %v2623_v61 = vsub.f32 %v24_v3, %v2584_v37 }
  0x2f   :  { %1749 = vmatmul.mubr.f32.gmra.mrb[4].mxu0 %v2922_v31  ;;  %v217_v24 = vsub.f32 %v2535_v40, %v2923_v44  ;;  %v2625_v45 = vand.u32 4294901760, %v26_v38  ;;  %1921 = vmatpush3.bf16.msra.mxu1 %v1918_v16  ;;  %v208_v46 = vand.u32 4294901760, %v207_v51  ;;  %v1926_v30 = vpack.c.bf16 %v352_v41, %v345_v7 }
  0x30   :  { %2924 = vst [vmem:[#allocation22_spill] sm:$0xff] %v2623_v61  ;;  %2017 = vmatpush3.bf16.msra.mxu0 %v2505_v19  ;;  %v2925_v28 = vand.u32 4294901760, %v2460_v56  ;;  %v2926_v31 = vand.u32 4294901760, %v2465_v11  ;;  %v2927_v34 = vand.u32 4294901760, %v2547_v60  ;;  %1583 = vmatprep.mubr.f32.mxu1 %v188_v58  ;;  %v2928_v3 = vand.u32 4294901760, %v2439_v4 }
  0x31   :  { %v359_v37 = vand.u32 4294901760, %v358_v21  ;;  %v246_v16 = vand.u32 4294901760, %v2596_v23  ;;  %v2929_v19 = vand.u32 4294901760, %v2561_v55  ;;  %v2642_v51 = vsub.f32 %v25_v59, %v2599_v20  ;;  %1923 = vmatprep.subr.bf16.mxu1 %v1922_v39  ;;  %2019 = vmatprep.subr.bf16.mxu0 %v2018_v33 }
  0x32   :  { %v2022_v62 = vpack.c.bf16 %v2926_v31, %v2925_v28  ;;  %v227_v44 = vsub.f32 %v2547_v60, %v2927_v34  ;;  %1751 = vmatprep.mubr.f32.mxu0 %v2928_v3  ;;  %v366_v7 = vand.u32 4294901760, %v365_v12  ;;  %v379_v28 = vsub.f32 %v2570_v9, %v378_v32  ;;  %1584 = vmatmul.mubr.f32.gmra.mrb[6].mxu1 %v198_v52 }
  0x33   :  { %v372_v41 = vsub.f32 %v2561_v55, %v2929_v19  ;;  %v385_v34 = vand.u32 4294901760, %v2609_v27  ;;  %v392_v58 = vand.u32 4294901760, %v2614_v29  ;;  %v2930_v21 = vand.u32 4294901760, %v2443_v8  ;;  %1925 = vmatpush3.bf16.msra.mxu1 %v1922_v39  ;;  %1586 = vmatprep.mubr.f32.mxu1 %v208_v46 }
  0x34   :  { %v218_v31 = vand.u32 4294901760, %v217_v24  ;;  %v237_v3 = vsub.f32 %v2582_v2, %v236_v25  ;;  %v256_v19 = vand.u32 4294901760, %v2623_v61  ;;  %v2652_v59 = vsub.f32 %v26_v38, %v2625_v45  ;;  %2021 = vmatpush3.bf16.msra.mxu0 %v2018_v33  ;;  %1927 = vmatprep.subr.bf16.mxu1 %v1926_v30 }
  0x35   :  { %1752 = vmatmul.mubr.f32.gmra.mrb[6].mxu0 %v2930_v21  ;;  %v228_v12 = vand.u32 4294901760, %v227_v44  ;;  %v2931_v4 = vand.u32 4294901760, %v2489_v22  ;;  %v2932_v52 = vand.u32 4294901760, %v2515_v15  ;;  %v2933_v8 = vand.u32 4294901760, %v2526_v50  ;;  %2023 = vmatprep.subr.bf16.mxu0 %v2022_v62 }
  0x36   :  { %v247_v24 = vsub.f32 %v2596_v23, %v246_v16  ;;  %v373_v2 = vand.u32 4294901760, %v372_v41  ;;  %v266_v20 = vand.u32 4294901760, %v2642_v51  ;;  %v1930_v38 = vpack.c.bf16 %v366_v7, %v359_v37  ;;  %1587 = vmatmul.mubr.f32.gmra.mrb[8].mxu1 %v218_v31 }
  0x37   :  { %1754 = vmatprep.mubr.f32.mxu0 %v2931_v4  ;;  %v2026_v21 = vpack.c.bf16 %v2933_v8, %v2932_v52  ;;  %v380_v39 = vand.u32 4294901760, %v379_v28  ;;  %v386_v33 = vsub.f32 %v2609_v27, %v385_v34  ;;  %v393_v46 = vsub.f32 %v2614_v29, %v392_v58  ;;  %1929 = vmatpush3.bf16.msra.mxu1 %v1926_v30 }
  0x38   :  { %v2934_v4 = vand.u32 4294901760, %v2535_v40  ;;  %v238_v44 = vand.u32 4294901760, %v237_v3  ;;  %v257_v8 = vsub.f32 %v2623_v61, %v256_v19  ;;  %v276_v52 = vand.u32 4294901760, %v2652_v59  ;;  %2025 = vmatpush3.bf16.msra.mxu0 %v2022_v62  ;;  %1589 = vmatprep.mubr.f32.mxu1 %v228_v12 }
  0x39   :  { %v2935_v41 = vand.u32 4294901760, %v2547_v60  ;;  %v248_v37 = vand.u32 4294901760, %v247_v24  ;;  %v267_v7 = vsub.f32 %v2642_v51, %v266_v20  ;;  %1931 = vmatprep.subr.bf16.mxu1 %v1930_v38  ;;  %2027 = vmatprep.subr.bf16.mxu0 %v2026_v21  ;;  %v1934_v28 = vpack.c.bf16 %v380_v39, %v373_v2 }
  0x3a   :  { %1755 = vmatmul.mubr.f32.gmra.mrb[8].mxu0 %v2934_v4  ;;  %v2936_v31 = vand.u32 4294901760, %v2561_v55  ;;  %v387_v3 = vand.u32 4294901760, %v386_v33  ;;  %v394_v23 = vand.u32 4294901760, %v393_v46  ;;  %1590 = vmatmul.mubr.f32.gmra.mrb[10].mxu1 %v238_v44  ;;  %v258_v61 = vand.u32 4294901760, %v257_v8 }
  0x3b   :  { %1757 = vmatprep.mubr.f32.mxu0 %v2935_v41  ;;  %v277_v30 = vsub.f32 %v2652_v59, %v276_v52  ;;  %1933 = vmatpush3.bf16.msra.mxu1 %v1930_v38  ;;  %v268_v62 = vand.u32 4294901760, %v267_v7  ;;  %v2034_v24 = vpack.c.bf16 %v392_v58, %v385_v34 }
  0x3c   :  { %v2030_v4 = vpack.c.bf16 %v378_v32, %v2936_v31  ;;  %2029 = vmatpush3.bf16.msra.mxu0 %v2026_v21  ;;  %1592 = vmatprep.mubr.f32.mxu1 %v248_v37  ;;  %v1938_v12 = vpack.c.bf16 %v394_v23, %v387_v3  ;;  %v2948_v23 = vld [vmem:[#allocation4_spill] sm:$0xff] }
  0x3d   :  { %1935 = vmatprep.subr.bf16.mxu1 %v1934_v28  ;;  %v278_v2 = vand.u32 4294901760, %v277_v30  ;;  %v2950_v32 = vld [vmem:[#allocation8_spill] sm:$0xff] }
  0x3e   :  { %1758 = vmatmul.mubr.f32.gmra.mrb[10].mxu0 %v236_v25  ;;  %2031 = vmatprep.subr.bf16.mxu0 %v2030_v4  ;;  %v1942_v25 = vpack.c.bf16 %v2272_v36, %v2270_v35  ;;  %v1950_v35 = vpack.c.bf16 %v2365_v6, %v2360_v5  ;;  %v2937_v36 = vld [vmem:[#allocation12_spill] sm:$0xff]  ;;  %v1962_v5 = vpack.c.bf16 %v2526_v50, %v2515_v15  ;;  %v2942_v6 = vld [vmem:[#allocation7_spill] sm:$0xff]  ;;  %v2945_v50 = vld [vmem:[#allocation21_spill] sm:$0xff] }
  0x3f   :  { %1760 = vmatprep.mubr.f32.mxu0 %v246_v16  ;;  %1593 = vmatmul.mubr.f32.gmra.mrb[12].mxu1 %v258_v61  ;;  %v1946_v61 = vpack.c.bf16 %v2315_v49, %v2313_v48  ;;  %v1958_v48 = vpack.c.bf16 %v2465_v11, %v2460_v56  ;;  %v2939_v49 = vld [vmem:[#allocation14_spill] sm:$0xff]  ;;  %v1966_v11 = vpack.c.bf16 %v2570_v9, %v2561_v55  ;;  %v2944_v15 = vld [vmem:[#allocation19_spill] sm:$0xff] }
  0x40   :  { %1937 = vmatpush3.bf16.msra.mxu1 %v1934_v28  ;;  %2033 = vmatpush3.bf16.msra.mxu0 %v2030_v4  ;;  %v1970_v56 = vpack.c.bf16 %v2614_v29, %v2609_v27  ;;  %v2946_v9 = vld [vmem:[#allocation10_spill] sm:$0xff]  ;;  %v2951_v27 = vld [vmem:[#allocation11_spill] sm:$0xff]  ;;  %v2952_v29 = vld [vmem:[#allocation13_spill] sm:$0xff] }
  0x41   :  { %1595 = vmatprep.mubr.f32.mxu1 %v268_v62  ;;  %1939 = vmatprep.subr.bf16.mxu1 %v1938_v12  ;;  %v2947_v55 = vld [vmem:[#allocation2_spill] sm:$0xff] }
  0x42   :  { %1761 = vmatmul.mubr.f32.gmra.mrb[12].mxu0 %v256_v19  ;;  %2035 = vmatprep.subr.bf16.mxu0 %v2034_v24 }
  0x43   :  { %1763 = vmatprep.mubr.f32.mxu0 %v266_v20  ;;  %1596 = vmatmul.mubr.f32.gmra.mrb[14].mxu1 %v278_v2  ;;  %v2949_v20 = vld [vmem:[#allocation6_spill] sm:$0xff] }
  0x44   :  { %1941 = vmatpush3.bf16.msra.mxu1 %v1938_v12  ;;  %2037 = vmatpush3.bf16.msra.mxu0 %v2034_v24 }
  0x45   :  { %1630 = vmatprep.mubr.f32.mxu1 %v2210_v17  ;;  %1943 = vmatprep.subr.bf16.mxu1 %v1942_v25 }
  0x46   :  { %1764 = vmatmul.mubr.f32.gmra.mrb[14].mxu0 %v276_v52  ;;  %2039 = vmatprep.subr.bf16.mxu0 %v2187_v10 }
  0x47   :  { %1798 = vmatprep.mubr.f32.mxu0 %v2210_v17  ;;  %1631 = vmatmul.mubr.f32.vlgmr.msra.gmra.mrb[0].mxu1 %v2241_v26 }
  0x48   :  { %1945 = vmatpush3.bf16.msra.mxu1 %v1942_v25  ;;  %1633 = vmatprep.mubr.f32.mxu1 %v2290_v42 }
  0x49   :  { %1947 = vmatprep.subr.bf16.mxu1 %v1946_v61 }
  0x4a   :  { %1799 = vmatmul.mubr.f32.vlgmr.msra.gmra.mrb[0].mxu0 %v2241_v26 }
  0x4b   :  { %2041 = vmatpush3.bf16.msra.mxu0 %v2187_v10  ;;  %1801 = vmatprep.mubr.f32.mxu0 %v2290_v42  ;;  %v1954_v10 = vpack.c.bf16 %v2425_v14, %v2408_v57  ;;  %v2940_v57 = vld [vmem:[#allocation17_spill] sm:$0xff] }
  0x4c   :  { %2043 = vmatprep.subr.bf16.mxu0 %v2191_v13  ;;  %1634 = vmatmul.mubr.f32.gmra.mrb[2].mxu1 %v2311_v47  ;;  %v2943_v14 = vld [vmem:[#allocation9_spill] sm:$0xff] }
  0x4d   :  { %1949 = vmatpush3.bf16.msra.mxu1 %v1946_v61  ;;  %1636 = vmatprep.mubr.f32.mxu1 %v2347_v63 }
  0x4e   :  { %1802 = vmatmul.mubr.f32.gmra.mrb[2].mxu0 %v2311_v47  ;;  %1951 = vmatprep.subr.bf16.mxu1 %v1950_v35 }
  0x4f   :  { %2045 = vmatpush3.bf16.msra.mxu0 %v2191_v13  ;;  %1804 = vmatprep.mubr.f32.mxu0 %v2347_v63  ;;  %v2938_v13 = vld [vmem:[#allocation3_spill] sm:$0xff] }
  0x50   :  { %2047 = vmatprep.subr.bf16.mxu0 %v2218_v18  ;;  %1637 = vmatmul.mubr.f32.gmra.mrb[4].mxu1 %v2350_v1 }
  0x51   :  { %1953 = vmatpush3.bf16.msra.mxu1 %v1950_v35  ;;  %1639 = vmatprep.mubr.f32.mxu1 %v2937_v36 }
  0x52   :  { %1805 = vmatmul.mubr.f32.gmra.mrb[4].mxu0 %v2350_v1  ;;  %1955 = vmatprep.subr.bf16.mxu1 %v1954_v10 }
  0x53   :  { %2049 = vmatpush3.bf16.msra.mxu0 %v2218_v18  ;;  %1807 = vmatprep.mubr.f32.mxu0 %v2937_v36  ;;  %v2941_v18 = vld [vmem:[#allocation5_spill] sm:$0xff] }
  0x54   :  { %2051 = vmatprep.subr.bf16.mxu0 %v2938_v13  ;;  %1640 = vmatmul.mubr.f32.gmra.mrb[6].mxu1 %v2939_v49 }
  0x55   :  { %1957 = vmatpush3.bf16.msra.mxu1 %v1954_v10  ;;  %1642 = vmatprep.mubr.f32.mxu1 %v2940_v57 }
  0x56   :  { %1808 = vmatmul.mubr.f32.gmra.mrb[6].mxu0 %v2939_v49  ;;  %1959 = vmatprep.subr.bf16.mxu1 %v1958_v48 }
  0x57   :  { %2053 = vmatpush3.bf16.msra.mxu0 %v2938_v13  ;;  %1810 = vmatprep.mubr.f32.mxu0 %v2940_v57 }
  0x58   :  { %2055 = vmatprep.subr.bf16.mxu0 %v2941_v18  ;;  %1643 = vmatmul.mubr.f32.gmra.mrb[8].mxu1 %v2491_v43 }
  0x59   :  { %1961 = vmatpush3.bf16.msra.mxu1 %v1958_v48  ;;  %1645 = vmatprep.mubr.f32.mxu1 %v2498_v53 }
  0x5a   :  { %1811 = vmatmul.mubr.f32.gmra.mrb[8].mxu0 %v2491_v43  ;;  %1963 = vmatprep.subr.bf16.mxu1 %v1962_v5 }
  0x5b   :  { %2057 = vmatpush3.bf16.msra.mxu0 %v2941_v18  ;;  %1813 = vmatprep.mubr.f32.mxu0 %v2498_v53 }
  0x5c   :  { %2059 = vmatprep.subr.bf16.mxu0 %v2942_v6  ;;  %1646 = vmatmul.mubr.f32.gmra.mrb[10].mxu1 %v2537_v0 }
  0x5d   :  { %1965 = vmatpush3.bf16.msra.mxu1 %v1962_v5  ;;  %1648 = vmatprep.mubr.f32.mxu1 %v2556_v54 }
  0x5e   :  { %1814 = vmatmul.mubr.f32.gmra.mrb[10].mxu0 %v2537_v0  ;;  %1967 = vmatprep.subr.bf16.mxu1 %v1966_v11 }
  0x5f   :  { %2061 = vmatpush3.bf16.msra.mxu0 %v2942_v6  ;;  %1816 = vmatprep.mubr.f32.mxu0 %v2556_v54 }
  0x60   :  { %2063 = vmatprep.subr.bf16.mxu0 %v2943_v14  ;;  %1649 = vmatmul.mubr.f32.gmra.mrb[12].mxu1 %v2944_v15 }
  0x61   :  { %1969 = vmatpush3.bf16.msra.mxu1 %v1966_v11  ;;  %1651 = vmatprep.mubr.f32.mxu1 %v2945_v50 }
  0x62   :  { %1817 = vmatmul.mubr.f32.gmra.mrb[12].mxu0 %v2944_v15  ;;  %1971 = vmatprep.subr.bf16.mxu1 %v1970_v56 }
  0x63   :  { %2065 = vmatpush3.bf16.msra.mxu0 %v2943_v14  ;;  %1819 = vmatprep.mubr.f32.mxu0 %v2945_v50 }
  0x64   :  { %2067 = vmatprep.subr.bf16.mxu0 %v2946_v9  ;;  %1652 = vmatmul.mubr.f32.gmra.mrb[14].mxu1 %v2625_v45 }
  0x65   :  { %1973 = vmatpush3.bf16.msra.mxu1 %v1970_v56  ;;  %1686 = vmatprep.mubr.f32.mxu1 %v2947_v55 }
  0x66   :  { %1820 = vmatmul.mubr.f32.gmra.mrb[14].mxu0 %v2625_v45 }
  0x67   :  { %2069 = vmatpush3.bf16.msra.mxu0 %v2946_v9  ;;  %1854 = vmatprep.mubr.f32.mxu0 %v2210_v17  ;;  %v2953_v17 = vld [vmem:[#allocation15_spill] sm:$0xff] }
  0x68   :  { %1687 = vmatmul.mubr.f32.vlgmr.msra.gmra.mrb[0].mxu1 %v2948_v23 }
  0x69   :  { %1689 = vmatprep.mubr.f32.mxu1 %v2949_v20 }
  0x6a   :  { %1855 = vmatmul.mubr.f32.vlgmr.msra.gmra.mrb[0].mxu0 %v2241_v26  ;;  %v2954_v26 = vld [vmem:[#allocation16_spill] sm:$0xff] }
  0x6b   :  { %1857 = vmatprep.mubr.f32.mxu0 %v2290_v42  ;;  %v2955_v42 = vld [vmem:[#allocation18_spill] sm:$0xff] }
  0x6c   :  { %1690 = vmatmul.mubr.f32.gmra.mrb[2].mxu1 %v2950_v32 }
  0x6d   :  { %1692 = vmatprep.mubr.f32.mxu1 %v2951_v27 }
  0x6e   :  { %1858 = vmatmul.mubr.f32.gmra.mrb[2].mxu0 %v2311_v47  ;;  %v2956_v47 = vld [vmem:[#allocation20_spill] sm:$0xff] }
  0x6f   :  { %1860 = vmatprep.mubr.f32.mxu0 %v2347_v63  ;;  %v2957_v63 = vld [vmem:[#allocation22_spill] sm:$0xff] }
  0x70   :  { %1693 = vmatmul.mubr.f32.gmra.mrb[4].mxu1 %v2952_v29 }
  0x71   :  { %1695 = vmatprep.mubr.f32.mxu1 %v2953_v17 }
  0x72   :  { %1861 = vmatmul.mubr.f32.gmra.mrb[4].mxu0 %v2350_v1 }
  0x73   :  { %1863 = vmatprep.mubr.f32.mxu0 %v2937_v36 }
  0x74   :  { %1696 = vmatmul.mubr.f32.gmra.mrb[6].mxu1 %v2954_v26 }
  0x75   :  { %1698 = vmatprep.mubr.f32.mxu1 %v2489_v22 }
  0x76   :  { %1864 = vmatmul.mubr.f32.gmra.mrb[6].mxu0 %v2939_v49 }
  0x77   :  { %1866 = vmatprep.mubr.f32.mxu0 %v2940_v57 }
  0x78   :  { %1699 = vmatmul.mubr.f32.gmra.mrb[8].mxu1 %v2535_v40 }
  0x79   :  { %1701 = vmatprep.mubr.f32.mxu1 %v2547_v60 }
  0x7a   :  { %1867 = vmatmul.mubr.f32.gmra.mrb[8].mxu0 %v2491_v43 }
  0x7b   :  { %1869 = vmatprep.mubr.f32.mxu0 %v2498_v53 }
  0x7c   :  { %1702 = vmatmul.mubr.f32.gmra.mrb[10].mxu1 %v2955_v42 }
  0x7d   :  { %1704 = vmatprep.mubr.f32.mxu1 %v2956_v47 }
  0x7e   :  { %1870 = vmatmul.mubr.f32.gmra.mrb[10].mxu0 %v2537_v0 }
  0x7f   :  { %1872 = vmatprep.mubr.f32.mxu0 %v2556_v54 }
  0x80   :  { %1705 = vmatmul.mubr.f32.gmra.mrb[12].mxu1 %v2957_v63 }
  0x81   :  { %1707 = vmatprep.mubr.f32.mxu1 %v2642_v51 }
  0x82   :  { %1873 = vmatmul.mubr.f32.gmra.mrb[12].mxu0 %v2944_v15 }
  0x83   :  { %1875 = vmatprep.mubr.f32.mxu0 %v2945_v50 }
  0x84   :  { %1708 = vmatmul.mubr.f32.gmra.mrb[14].mxu1 %v2652_v59 }
  0x86   :  { %1876 = vmatmul.mubr.f32.gmra.mrb[14].mxu0 %v2625_v45 }
 0x13b   :  { %v1688_v43 = vpop.f32.mrb[0].mxu1 }
 0x13c   :  { %v625_v53 = vpop.f32.mrb[1].mxu1 }
 0x13d   :  { %v1856_v1 = vpop.f32.mrb[0].mxu0 }
 0x13e   :  { %v2070_v22 = vadd.f32 %v1856_v1, %v1688_v43  ;;  %v1235_v40 = vpop.f32.mrb[1].mxu0 }
 0x13f   :  { %v2071_v0 = vadd.f32 %v1235_v40, %v625_v53  ;;  %v1691_v60 = vpop.f32.mrb[2].mxu1 }
 0x140   :  { %1331 = vst.msk [vmem:[%s2836_s2 + $0x8] sm:$0xff] %vm1329_vm0, %v2070_v22  ;;  %v639_v16 = vpop.f32.mrb[3].mxu1 }
 0x141   :  { %1330 = vst.msk [vmem:[%s2836_s2] sm:$0xff] %vm1329_vm0, %v2071_v0  ;;  %v1859_v54 = vpop.f32.mrb[2].mxu0 }
 0x142   :  { %v2072_v45 = vadd.f32 %v1859_v54, %v1691_v60  ;;  %v1247_v51 = vpop.f32.mrb[3].mxu0 }
 0x143   :  { %v2073_v34 = vadd.f32 %v1247_v51, %v639_v16  ;;  %v1694_v58 = vpop.f32.mrb[4].mxu1 }
 0x144   :  { %1333 = vst.msk [vmem:[%s2836_s2 + $0x18] sm:$0xff] %vm1329_vm0, %v2072_v45  ;;  %v653_v21 = vpop.f32.mrb[5].mxu1 }
 0x145   :  { %1332 = vst.msk [vmem:[%s2836_s2 + $0x10] sm:$0xff] %vm1329_vm0, %v2073_v34  ;;  %v1862_v19 = vpop.f32.mrb[4].mxu0 }
 0x146   :  { %v2074_v59 = vadd.f32 %v1862_v19, %v1694_v58  ;;  %v1259_v38 = vpop.f32.mrb[5].mxu0 }
 0x147   :  { %v2075_v39 = vadd.f32 %v1259_v38, %v653_v21  ;;  %v1697_v33 = vpop.f32.mrb[6].mxu1 }
 0x148   :  { %1335 = vst.msk [vmem:[%s2836_s2 + $0x28] sm:$0xff] %vm1329_vm0, %v2074_v59  ;;  %v667_v8 = vpop.f32.mrb[7].mxu1 }
 0x149   :  { %1334 = vst.msk [vmem:[%s2836_s2 + $0x20] sm:$0xff] %vm1329_vm0, %v2075_v39  ;;  %v1865_v46 = vpop.f32.mrb[6].mxu0 }
 0x14a   :  { %v2076_v44 = vadd.f32 %v1865_v46, %v1697_v33  ;;  %v1271_v52 = vpop.f32.mrb[7].mxu0 }
 0x14b   :  { %v2077_v41 = vadd.f32 %v1271_v52, %v667_v8  ;;  %v1700_v37 = vpop.f32.mrb[8].mxu1 }
 0x14c   :  { %1337 = vst.msk [vmem:[%s2836_s2 + $0x38] sm:$0xff] %vm1329_vm0, %v2076_v44  ;;  %v681_v31 = vpop.f32.mrb[9].mxu1 }
 0x14d   :  { %1336 = vst.msk [vmem:[%s2836_s2 + $0x30] sm:$0xff] %vm1329_vm0, %v2077_v41  ;;  %v1868_v7 = vpop.f32.mrb[8].mxu0 }
 0x14e   :  { %v2078_v28 = vadd.f32 %v1868_v7, %v1700_v37  ;;  %v1283_v4 = vpop.f32.mrb[9].mxu0 }
 0x14f   :  { %v2079_v3 = vadd.f32 %v1283_v4, %v681_v31  ;;  %v1703_v30 = vpop.f32.mrb[10].mxu1 }
 0x150   :  { %1339 = vst.msk [vmem:[%s2836_s2 + $0x48] sm:$0xff] %vm1329_vm0, %v2078_v28  ;;  %v695_v24 = vpop.f32.mrb[11].mxu1 }
 0x151   :  { %1338 = vst.msk [vmem:[%s2836_s2 + $0x40] sm:$0xff] %vm1329_vm0, %v2079_v3  ;;  %v1871_v62 = vpop.f32.mrb[10].mxu0 }
 0x152   :  { %v2080_v12 = vadd.f32 %v1871_v62, %v1703_v30  ;;  %v1295_v2 = vpop.f32.mrb[11].mxu0 }
 0x153   :  { %v2081_v25 = vadd.f32 %v1295_v2, %v695_v24  ;;  %v1706_v61 = vpop.f32.mrb[12].mxu1 }
 0x154   :  { %1341 = vst.msk [vmem:[%s2836_s2 + $0x58] sm:$0xff] %vm1329_vm0, %v2080_v12  ;;  %v709_v36 = vpop.f32.mrb[13].mxu1 }
 0x155   :  { %1340 = vst.msk [vmem:[%s2836_s2 + $0x50] sm:$0xff] %vm1329_vm0, %v2081_v25  ;;  %v1874_v35 = vpop.f32.mrb[12].mxu0 }
 0x156   :  { %v2082_v10 = vadd.f32 %v1874_v35, %v1706_v61  ;;  %v1307_v13 = vpop.f32.mrb[13].mxu0 }
 0x157   :  { %v2083_v48 = vadd.f32 %v1307_v13, %v709_v36  ;;  %v1709_v49 = vpop.f32.mrb[14].mxu1 }
 0x158   :  { %1343 = vst.msk [vmem:[%s2836_s2 + $0x68] sm:$0xff] %vm1329_vm0, %v2082_v10  ;;  %v723_v5 = vpop.f32.mrb[15].mxu1 }
 0x159   :  { %1342 = vst.msk [vmem:[%s2836_s2 + $0x60] sm:$0xff] %vm1329_vm0, %v2083_v48  ;;  %v1877_v57 = vpop.f32.mrb[14].mxu0 }
 0x15a   :  { %v2084_v18 = vadd.f32 %v1877_v57, %v1709_v49  ;;  %v1319_v6 = vpop.f32.mrb[15].mxu0 }
 0x15b   :  { %v2085_v11 = vadd.f32 %v1319_v6, %v723_v5 }
 0x15c   :  { %1345 = vst.msk [vmem:[%s2836_s2 + $0x78] sm:$0xff] %vm1329_vm0, %v2084_v18 }
 0x15d   :  { %1344 = vst.msk [vmem:[%s2836_s2 + $0x70] sm:$0xff] %vm1329_vm0, %v2085_v11 }

</bundles_post_ra>
